<compile_context>
chip_gen: v5e
topology: v5e:2x2
jax: 0.10.0
libtpu: 0.0.40
codegen_flags: <defaults>
</compile_context>

<pallas_src>
import jax
import jax.numpy as jnp
from jax.experimental import pallas as pl
from jax.experimental.pallas import tpu as pltpu


def _round_up(x, m):
    return ((x + m - 1) // m) * m


def _conv1x1_tile_kernel(w_ref, b_ref, x_ref, o_ref):
    # w_ref: (C_out, C_in)   b_ref: (C_out, 1)
    # x_ref: (C_in, T)       o_ref: (C_out, T)   (T a multiple of 128)
    acc = jnp.dot(w_ref[...], x_ref[...], preferred_element_type=jnp.float32)
    acc = acc + b_ref[...].astype(jnp.float32)        # broadcast over lanes
    o_ref[...] = acc.astype(o_ref.dtype)


def _conv1x1_full_kernel(w_ref, b_ref, x_ref, o_ref):
    # Small-problem fast path: whole arrays resident in VMEM.
    # x_ref: (N, C_in, HW)   o_ref: (N, C_out, HW)   (N is small here)
    w = w_ref[...]
    b = b_ref[...].astype(jnp.float32)
    for n in range(x_ref.shape[0]):                   # static, tiny unroll
        acc = jnp.dot(w, x_ref[n], preferred_element_type=jnp.float32) + b
        o_ref[n] = acc.astype(o_ref.dtype)


def outconv_forward(x_nchw, weight, bias, *, hw_tile=None,
                    vmem_budget_bytes=4 * 1024 * 1024,
                    small_problem_bytes=1 * 1024 * 1024):
    """1x1 conv forward (NCHW, matches nn.Conv2d(in_ch, out_ch, 1)).

    x_nchw : (N, C_in, H, W)
    weight : (C_out, C_in, 1, 1)
    bias   : (C_out,)
    returns: (N, C_out, H, W)
    """
    N, C_in, H, W = x_nchw.shape
    C_out = weight.shape[0]
    HW = H * W

    # Pure reshapes only (no transposes): pixel dim stays the fast/lane axis.
    x3 = x_nchw.reshape(N, C_in, HW)
    w_mat = weight.reshape(C_out, C_in)
    b_col = bias.reshape(C_out, 1)

    itemsize = jnp.dtype(x_nchw.dtype).itemsize
    # VMEM bytes per pixel column: x block + out block, each double-buffered,
    # with channels padded to the 8-sublane tile (real VMEM cost at C=4/8).
    cin_pad = _round_up(C_in, 8)
    cout_pad = _round_up(C_out, 8)
    per_px_vmem = (cin_pad + cout_pad) * itemsize * 2

    cost = pl.CostEstimate(
        flops=2 * N * HW * C_in * C_out,
        transcendentals=0,
        bytes_accessed=N * (C_in + C_out) * HW * itemsize
        + (w_mat.size + b_col.size) * jnp.dtype(weight.dtype).itemsize,
    )

    # ---------- Small-problem fast path: one invocation, one DMA each way ----
    total_vmem_bytes = (cin_pad + cout_pad) * itemsize * N * _round_up(HW, 128)
    if hw_tile is None and N <= 16 and total_vmem_bytes <= small_problem_bytes:
        out3 = pl.pallas_call(
            _conv1x1_full_kernel,
            out_shape=jax.ShapeDtypeStruct((N, C_out, HW), x_nchw.dtype),
            cost_estimate=cost,
        )(w_mat, b_col, x3)
        return out3.reshape(N, C_out, H, W)

    # ---------- Tiled path: grid over (batch, pixel tiles) -------------------
    if hw_tile is None:
        hw_tile = max(128, (vmem_budget_bytes // per_px_vmem) // 128 * 128)
    hw_tile = min(hw_tile, _round_up(HW, 128))
    hw_tile = max(128, (hw_tile // 128) * 128)
    n_tiles = pl.cdiv(HW, hw_tile)

    # v7x has 2 TensorCores: make sure the parallel grid has >= 2 steps.
    if N * n_tiles < 2 and HW > 128:
        hw_tile = max(128, _round_up(pl.cdiv(HW, 2), 128))
        n_tiles = pl.cdiv(HW, hw_tile)

    # No host-side padding: the last pixel tile may be partial; Pallas masks
    # the out-of-bounds output lanes on writeback and OOB input lanes are
    # harmless for this pointwise (per-pixel) op.
    out3 = pl.pallas_call(
        _conv1x1_tile_kernel,
        out_shape=jax.ShapeDtypeStruct((N, C_out, HW), x_nchw.dtype),
        grid_spec=pltpu.PrefetchScalarGridSpec(
            num_scalar_prefetch=0,
            grid=(N, n_tiles),
            in_specs=[
                pl.BlockSpec((C_out, C_in), lambda n, t: (0, 0)),    # weights (resident)
                pl.BlockSpec((C_out, 1), lambda n, t: (0, 0)),       # bias (resident)
                pl.BlockSpec((pl.Squeezed(), C_in, hw_tile),
                             lambda n, t: (n, 0, t)),
                # If a v7x profile ever shows exposed input DMA at this tile
                # size, add pipeline_mode=pl.Buffered(3) on the x spec above.
            ],
            out_specs=pl.BlockSpec((pl.Squeezed(), C_out, hw_tile),
                                   lambda n, t: (n, 0, t)),
        ),
        compiler_params=pltpu.CompilerParams(
            dimension_semantics=("parallel", "parallel"),
        ),
        cost_estimate=cost,
    )(w_mat, b_col, x3)

    return out3.reshape(N, C_out, H, W)


if __name__ == "__main__":
    key = jax.random.PRNGKey(0)

    def ref_conv1x1(x, w, b):
        c_out, c_in = w.shape[0], w.shape[1]
        return (jnp.einsum("nchw,oc->nohw", x, w.reshape(c_out, c_in))
                + b.reshape(1, c_out, 1, 1))

    # Case 1: nominal outconv(in_ch=4, out_ch=8) shape (hits the fast path).
    N, C_in, C_out, H, W = 2, 4, 8, 16, 16
    kx, kw, kb = jax.random.split(key, 3)
    bound = 1.0 / (C_in ** 0.5)
    x = jax.random.normal(kx, (N, C_in, H, W), dtype=jnp.float32)
    weight = jax.random.uniform(kw, (C_out, C_in, 1, 1), minval=-bound,
                                maxval=bound, dtype=jnp.float32)
    bias = jax.random.uniform(kb, (C_out,), minval=-bound, maxval=bound,
                              dtype=jnp.float32)

    out = jax.block_until_ready(outconv_forward(x, weight, bias))
    ref = ref_conv1x1(x, weight, bias)
    assert out.shape == (N, C_out, H, W)
    assert jnp.allclose(out, ref, atol=1e-5, rtol=1e-5)

    # Case 2: ragged pixel count (H*W = 529, not a multiple of 128), forced
    # onto the tiled path with a small tile so the partial edge block
    # (masked writeback) is exercised and validated.
    H2, W2 = 23, 23
    x2 = jax.random.normal(kx, (1, C_in, H2, W2), dtype=jnp.float32)
    out2 = jax.block_until_ready(outconv_forward(x2, weight, bias, hw_tile=128))
    ref2 = ref_conv1x1(x2, weight, bias)
    assert out2.shape == (1, C_out, H2, W2)
    assert jnp.allclose(out2, ref2, atol=1e-5, rtol=1e-5)

    print("KERNEL_OK")
</pallas_src>

<mosaic_0001>
module attributes {stable_mosaic.version = 11 : i64} {
  func.func @_conv1x1_full_kernel(%arg0: memref<8x4xf32, #tpu.memory_space<vmem>>, %arg1: memref<8x1xf32, #tpu.memory_space<vmem>>, %arg2: memref<2x4x256xf32, #tpu.memory_space<vmem>>, %arg3: memref<2x8x256xf32, #tpu.memory_space<vmem>>) attributes {dimension_semantics = [], scalar_prefetch = 0 : i64, scratch_operands = 0 : i64, tpu.core_type = #tpu.core_type<tc>} {
    %c0 = arith.constant 0 : index
    %c0_0 = arith.constant 0 : index
    %0 = vector.load %arg0[%c0, %c0_0] : memref<8x4xf32, #tpu.memory_space<vmem>>, vector<8x4xf32>
    %c0_1 = arith.constant 0 : index
    %c0_2 = arith.constant 0 : index
    %1 = vector.load %arg1[%c0_1, %c0_2] : memref<8x1xf32, #tpu.memory_space<vmem>>, vector<8x1xf32>
    %c0_3 = arith.constant 0 : index
    %c0_4 = arith.constant 0 : index
    %c0_5 = arith.constant 0 : index
    %2 = vector.load %arg2[%c0_3, %c0_4, %c0_5] : memref<2x4x256xf32, #tpu.memory_space<vmem>>, vector<1x4x256xf32>
    %3 = vector.shape_cast %2 : vector<1x4x256xf32> to vector<4x256xf32>
    %cst = arith.constant dense<0.000000e+00> : vector<8x256xf32>
    %4 = tpu.matmul %0, %3, %cst {dimension_numbers = #tpu.dot_dimension_numbers<[1], [0], [0], [1], [0, 0, 1, 1], [], []>} : vector<8x4xf32>, vector<4x256xf32>, vector<8x256xf32> -> vector<8x256xf32>
    %5 = vector.broadcast %1 : vector<8x1xf32> to vector<8x256xf32>
    %6 = arith.addf %4, %5 : vector<8x256xf32>
    %c0_6 = arith.constant 0 : index
    %c0_7 = arith.constant 0 : index
    %c0_8 = arith.constant 0 : index
    %7 = vector.load %arg3[%c0_6, %c0_7, %c0_8] : memref<2x8x256xf32, #tpu.memory_space<vmem>>, vector<1x8x256xf32>
    %8 = vector.shape_cast %7 : vector<1x8x256xf32> to vector<8x256xf32>
    %9 = vector.shape_cast %6 : vector<8x256xf32> to vector<1x8x256xf32>
    tpu.vector_store %arg3[%c0_6, %c0_7, %c0_8], %9 {strides = array<i32>} : memref<2x8x256xf32, #tpu.memory_space<vmem>>, vector<1x8x256xf32>,
    %c1 = arith.constant 1 : index
    %c0_9 = arith.constant 0 : index
    %c0_10 = arith.constant 0 : index
    %10 = vector.load %arg2[%c1, %c0_9, %c0_10] : memref<2x4x256xf32, #tpu.memory_space<vmem>>, vector<1x4x256xf32>
    %11 = vector.shape_cast %10 : vector<1x4x256xf32> to vector<4x256xf32>
    %cst_11 = arith.constant dense<0.000000e+00> : vector<8x256xf32>
    %12 = tpu.matmul %0, %11, %cst_11 {dimension_numbers = #tpu.dot_dimension_numbers<[1], [0], [0], [1], [0, 0, 1, 1], [], []>} : vector<8x4xf32>, vector<4x256xf32>, vector<8x256xf32> -> vector<8x256xf32>
    %13 = vector.broadcast %1 : vector<8x1xf32> to vector<8x256xf32>
    %14 = arith.addf %12, %13 : vector<8x256xf32>
    %c1_12 = arith.constant 1 : index
    %c0_13 = arith.constant 0 : index
    %c0_14 = arith.constant 0 : index
    %15 = vector.load %arg3[%c1_12, %c0_13, %c0_14] : memref<2x8x256xf32, #tpu.memory_space<vmem>>, vector<1x8x256xf32>
    %16 = vector.shape_cast %15 : vector<1x8x256xf32> to vector<8x256xf32>
    %17 = vector.shape_cast %14 : vector<8x256xf32> to vector<1x8x256xf32>
    tpu.vector_store %arg3[%c1_12, %c0_13, %c0_14], %17 {strides = array<i32>} : memref<2x8x256xf32, #tpu.memory_space<vmem>>, vector<1x8x256xf32>,
    return
  }
}

</mosaic_0001>

<bundles_post_ra>
// kernel: tpu_custom_call.1
= control target key start
LH: loop header
LB: loop body
LE: loop exit
PB: predicated region body
PF: predicated region fallthrough
CT: control target
= control target key end

     0   :  { %v189_v1 = vmov 0   ;;  %s228_s0 = inlined_call_operand.vmem [shape: f32[8,4], index: 0, kind: input, shape index: {}]   ;;  %s229_s1 = inlined_call_operand.vmem [shape: f32[8,1], index: 1, kind: input, shape index: {}]   ;;  %s230_s2 = inlined_call_operand.vmem [shape: f32[2,4,256], index: 2, kind: input, shape index: {}]   ;;  %s231_s3 = inlined_call_operand.hbm [shape: f32[2,8,256], index: 3, kind: output, shape index: {}]  }
   0x1   :  { %v17_v0 = vld [vmem:[%s230_s2] sm:$0xff]  ;;  %162 = vset.pattern.permute.xlu0 %v189_v1 }
   0x2   :  { %24 = vst [vmem:[#allocation1] ss:$2 sm:$0xff] %v17_v0  ;;  %v16_v2 = vld [vmem:[%s229_s1] sm:$0xff] }
   0x3   :  { %8 = vsyncpa [#allocation3], 0  ;;  %20 = vperm.xlu0 %162, %v16_v2   ;;  %v153_v3 = vld [vmem:[%s230_s2 + $0x8] sm:$0xff]  ;;  %vm31_vm0 = vcmask 1043456   ;;  %v15_v6 = vld [vmem:[%s228_s0] sm:$0xff]  ;;  %vm27_vm1 = vcmask 31744  }
   0x4   :  { %s190_s1 = smov [#allocation2]   ;;  %s137_s21 = sshll.u32 %s231_s3, 4  ;;  %s138_s21 = int_to_ptr.hbm [resolvable:$true] %s137_s21 }
   0x5   :  { %s135_s0 = sshll.u32 %s190_s1, 4  ;;  %s191_s22 = smov 256   ;;  %s136_s0 = int_to_ptr.vmem [resolvable:$true] %s135_s0 }
   0x6   :  { %s192_s23 = smov 16  }
   0x9   :  { %v25_v4 = vld.sshfl [vmem:[#allocation1] sm:$0xff pattern:$0x75316420]  ;;  %v26_v5 = vld.sshfl [vmem:[#allocation1 + $0x8] sm:$0xff pattern:$0x75316420] }
   0xa   :  { %81 = vst [vmem:[#allocation1] ss:$2 sm:$0xff] %v153_v3  ;;  %149 = vmatpush.msk.msra.mxu0 %vm31_vm0, %v25_v4  ;;  %151 = vmatpush.msk.msra.mxu1 %vm31_vm0, %v26_v5 }
   0xb   :  { %150 = vmatmul.msk.f32.vlgmr.msra.gmra.mxu0 %vm27_vm1, %v15_v6  ;;  %152 = vmatmul.msk.f32.vlgmr.msra.gmra.mxu1 %vm27_vm1, %v15_v6 }
  0x11   :  { %v82_v7 = vld.sshfl [vmem:[#allocation1] sm:$0xff pattern:$0x75316420]  ;;  %v83_v8 = vld.sshfl [vmem:[#allocation1 + $0x8] sm:$0xff pattern:$0x75316420] }
  0x12   :  { %154 = vmatpush.msk.msra.mxu2 %vm31_vm0, %v82_v7  ;;  %156 = vmatpush.msk.msra.mxu3 %vm31_vm0, %v83_v8 }
  0x13   :  { %155 = vmatmul.msk.f32.vlgmr.msra.gmra.mxu2 %vm27_vm1, %v15_v6  ;;  %157 = vmatmul.msk.f32.vlgmr.msra.gmra.mxu3 %vm27_vm1, %v15_v6 }
  0x75   :  { %v21_v9 = vpop.permute.xlu0 %20 }
  0x88   :  { %v53_v10 = vpop.f32.mrf.mxu0  ;;  %v73_v11 = vpop.f32.mrf.mxu1 }
  0x89   :  { %v54_v12 = vadd.f32 %v53_v10, %v21_v9  ;;  %v74_v13 = vadd.f32 %v73_v11, %v21_v9 }
  0x8b   :  { %76 = vst [vmem:[#allocation2] sm:$0xff] %v54_v12 }
  0x8c   :  { %77 = vst [vmem:[#allocation2 + $0x8] sm:$0xff] %v74_v13 }
  0x96   :  { %v105_v14 = vpop.f32.mrf.mxu2  ;;  %v125_v15 = vpop.f32.mrf.mxu3 }
  0x97   :  { %v106_v16 = vadd.f32 %v105_v14, %v21_v9  ;;  %v126_v17 = vadd.f32 %v125_v15, %v21_v9 }
  0x99   :  { %129 = vst [vmem:[#allocation2 + $0x10] sm:$0xff] %v106_v16 }
  0x9a   :  { %130 = vst [vmem:[#allocation2 + $0x18] sm:$0xff] %v126_v17 }
  0x9b   :  { %143 = dma.vmem_to_hbm [thread:$0]  %s136_s0, 512, %s138_s21, [#allocation3], %s191_s22, %s191_s22, %s192_s23  }
  0x9c   :  { %187 = dma.done.wait [#allocation3], 512  }
  0x9d   :  { %188 = vsyncadd [#allocation3], 4294966784 }
  0x9e   :  { %148 = vsyncpa [#allocation3], 1 }

</bundles_post_ra>
